<compile_context>
chip_gen: v6e
topology: v6e:2x2x1
jax: 0.10.0
libtpu: 0.0.40
codegen_flags: <defaults>
</compile_context>

<pallas_src>
import jax
import jax.numpy as jnp
import numpy as np
from jax.experimental import pallas as pl
from jax.experimental.pallas import tpu as pltpu


def _num_tensorcores():
    """TensorCores per device (2 on multi-TC parts such as v7x, else 1)."""
    n = 1
    try:
        info = pltpu.get_tpu_info()
        for attr in ("num_cores", "core_count", "num_tensorcores"):
            v = getattr(info, attr, None)
            if v:
                n = int(v)
                break
    except Exception:
        pass
    if n <= 1:
        try:
            v = getattr(jax.devices()[0], "num_cores", None)
            if v:
                n = int(v)
        except Exception:
            pass
    return max(1, min(2, n))


def _vmem_capacity_bytes():
    try:
        return int(pltpu.get_tpu_info().vmem_capacity_bytes)
    except Exception:
        return 64 << 20  # conservative default (v7x physical VMEM)


def _rfft_layout(W):
    """Lane-dense rDFT column layout: (Wr, padded width P, used cols, side?)."""
    Wr = W // 2 + 1
    if Wr > 128 and (Wr - 1) % 128 == 0:
        # W = 256, 512, ...: don't pad a full 128-lane group for one column.
        return Wr, Wr - 1, Wr - 1, True
    P = ((Wr + 127) // 128) * 128
    return Wr, P, Wr, False


def _dft_matrices(H, W, P, ncols):
    """bf16 fused real-DFT matrices; cwsw zero-padded to lane-dense width P."""
    h = np.arange(H, dtype=np.float64)
    ang_h = (-2.0 * np.pi / H) * np.outer(h, h)                    # (H, H)
    chsh = np.concatenate([np.cos(ang_h), np.sin(ang_h)], axis=0)  # (2H, H)

    w = np.arange(W, dtype=np.float64)
    v = np.arange(ncols, dtype=np.float64)
    ang_w = (-2.0 * np.pi / W) * np.outer(w, v)                    # (W, ncols)
    cw = np.zeros((W, P), dtype=np.float64)
    sw = np.zeros((W, P), dtype=np.float64)
    cw[:, :ncols] = np.cos(ang_w)
    sw[:, :ncols] = np.sin(ang_w)
    cwsw = np.concatenate([cw, sw], axis=1)                        # (W, 2P)
    return (jnp.asarray(chsh, dtype=jnp.bfloat16),
            jnp.asarray(cwsw, dtype=jnp.bfloat16))


def _choose_tb(H, W, P, per_core, vmem_limit):
    # Rough per-image bytes in one grid step: bf16 input block (x2 pipeline
    # buffers) + f32/bf16 stage-1 output + broadcast chsh + f32 stage-2 output
    # + combine/abs temporaries.  Constants: double-buffered DFT matrices and
    # the resident accumulator block.
    per_tb = 4 * H * W + 40 * H * P + 4 * H * H
    const = 8 * W * P + 8 * H * H + 8 * H * P
    budget = int(vmem_limit * 0.6)
    cap = max(1, (budget - const) // max(per_tb, 1))
    target = max(1, 1024 // H)          # aim for ~1024 rows in the stage-1 M dim
    return int(max(1, min(target, cap, per_core)))


def _make_kernel(TB, H, P):
    def kernel(d_ref, cwsw_ref, chsh_ref, out_ref):
        # out_ref: (1, H, P) per-core accumulator, resident across the
        # reduction ("arbitrary") grid axis.
        @pl.when(pl.program_id(1) == 0)
        def _():
            out_ref[...] = jnp.zeros_like(out_ref)

        W = d_ref.shape[-1]
        # Row-merge of the two major dims: layout-preserving when H % 8 == 0
        # (still correct otherwise, just a relayout).
        d2 = d_ref[...].reshape(TB * H, W)                   # bf16

        # Stage 1: W-direction rDFT, one fused matmul.
        # Columns [0:P) = a_re, [P:2P) = a_im (zero-padded columns -> exact 0).
        a = jnp.dot(d2, cwsw_ref[...],
                    preferred_element_type=jnp.float32)      # (TB*H, 2P) f32
        a_bf = a.astype(jnp.bfloat16).reshape(TB, H, 2 * P)  # single cast

        # Stage 2: H-direction DFT, one batched matmul (no per-image unroll).
        chshb = jnp.broadcast_to(chsh_ref[...], (TB, 2 * H, H))
        g = jnp.einsum('buh,bhp->bup', chshb, a_bf,
                       preferred_element_type=jnp.float32)   # (TB, 2H, 2P) f32

        # g[:, :H, :P]=CH@a_re   g[:, :H, P:]=CH@a_im
        # g[:, H:, :P]=SH@a_re   g[:, H:, P:]=SH@a_im
        f_re = g[:, :H, :P] - g[:, H:, P:]
        f_im = g[:, :H, P:] + g[:, H:, :P]
        out_ref[...] += jnp.sum(jnp.abs(f_re) + jnp.abs(f_im),
                                axis=0, keepdims=True)       # (1, H, P)

    return kernel


@jax.jit
def fft_loss(sr, hr):
    """FFTLoss.forward: mean L1 over stacked (real, imag) of rfft2(sr), rfft2(hr)."""
    assert sr.shape == hr.shape and sr.ndim == 4
    N, C, H, W = sr.shape
    B = N * C
    Wr, P, ncols, has_side = _rfft_layout(W)

    # Subtract in f32 BEFORE any bf16 cast; rfft2 is linear so the kernel
    # transforms the difference once.
    d = (sr.astype(jnp.float32) - hr.astype(jnp.float32)).reshape(B, H, W)
    d_bf = d.astype(jnp.bfloat16)

    ncores = _num_tensorcores()
    vmem_limit = min(int(_vmem_capacity_bytes() * 0.75), 100 << 20)

    per_core = -(-B // ncores)
    TB = _choose_tb(H, W, P, per_core, vmem_limit)
    steps = -(-per_core // TB)
    Bp = ncores * TB * steps
    if Bp > B:
        # Zero images: their transform is 0 -> contribute 0 to the L1 sum.
        d_bf = jnp.pad(d_bf, ((0, Bp - B), (0, 0), (0, 0)))

    chsh, cwsw = _dft_matrices(H, W, P, ncols)

    out = pl.pallas_call(
        _make_kernel(TB, H, P),
        out_shape=jax.ShapeDtypeStruct((ncores, H, P), jnp.float32),
        grid_spec=pltpu.PrefetchScalarGridSpec(
            num_scalar_prefetch=0,
            grid=(ncores, steps),
            in_specs=[
                pl.BlockSpec((TB, H, W), lambda c, s: (c * steps + s, 0, 0)),
                pl.BlockSpec((W, 2 * P), lambda c, s: (0, 0)),
                pl.BlockSpec((2 * H, H), lambda c, s: (0, 0)),
            ],
            out_specs=pl.BlockSpec((1, H, P), lambda c, s: (c, 0, 0)),
        ),
        compiler_params=pltpu.CompilerParams(
            dimension_semantics=("parallel", "arbitrary"),
            vmem_limit_bytes=vmem_limit),
    )(d_bf, cwsw, chsh)

    total = jnp.sum(out)

    if has_side:
        # Exact f32 handling of the single rfft column (v = Wr-1) excluded
        # from the lane-dense main matmuls.  Tiny: O(B*H*W + B*H*H) work.
        vs = float(Wr - 1)
        ang_w = np.arange(W, dtype=np.float64) * (-2.0 * np.pi * vs / W)
        cw_s = jnp.asarray(np.cos(ang_w), jnp.float32)
        sw_s = jnp.asarray(np.sin(ang_w), jnp.float32)
        h = np.arange(H, dtype=np.float64)
        ang_h = (-2.0 * np.pi / H) * np.outer(h, h)
        ch = jnp.asarray(np.cos(ang_h), jnp.float32)
        sh = jnp.asarray(np.sin(ang_h), jnp.float32)
        s_re = jnp.einsum('bhw,w->bh', d, cw_s)
        s_im = jnp.einsum('bhw,w->bh', d, sw_s)
        f_re = jnp.einsum('uh,bh->bu', ch, s_re) - jnp.einsum('uh,bh->bu', sh, s_im)
        f_im = jnp.einsum('uh,bh->bu', ch, s_im) + jnp.einsum('uh,bh->bu', sh, s_re)
        total = total + jnp.sum(jnp.abs(f_re) + jnp.abs(f_im))

    # torch L1Loss(reduction='mean') over the stacked (N, C, H, Wr, 2) tensor.
    count = jnp.float32(B * H * Wr * 2)
    return total / count


def fft_loss_reference(sr, hr):
    sr_fft = jnp.fft.rfft2(sr)
    hr_fft = jnp.fft.rfft2(hr)
    sr_s = jnp.stack([sr_fft.real, sr_fft.imag], axis=-1)
    hr_s = jnp.stack([hr_fft.real, hr_fft.imag], axis=-1)
    return jnp.mean(jnp.abs(sr_s - hr_s))


if __name__ == "__main__":
    key = jax.random.PRNGKey(0)
    k1, k2, k3, k4 = jax.random.split(key, 4)

    # Nominal small shape for the module.
    sr = jax.random.normal(k1, (2, 4, 16, 16), dtype=jnp.float32)
    hr = jax.random.normal(k2, (2, 4, 16, 16), dtype=jnp.float32)
    loss = jax.block_until_ready(fft_loss(sr, hr))
    ref = jax.block_until_ready(fft_loss_reference(sr, hr))
    np.testing.assert_allclose(np.asarray(loss), np.asarray(ref),
                               rtol=2e-2, atol=1e-2)

    # Second shape exercises the Nyquist side-column path (Wr = 129) and the
    # sr ~= hr regime that previously suffered bf16 cancellation.
    sr2 = jax.random.normal(k3, (1, 2, 64, 256), dtype=jnp.float32)
    hr2 = sr2 + 0.05 * jax.random.normal(k4, (1, 2, 64, 256), dtype=jnp.float32)
    loss2 = jax.block_until_ready(fft_loss(sr2, hr2))
    ref2 = jax.block_until_ready(fft_loss_reference(sr2, hr2))
    np.testing.assert_allclose(np.asarray(loss2), np.asarray(ref2),
                               rtol=2e-2, atol=1e-3)

    print("KERNEL_OK")
</pallas_src>

<mosaic_0001>
module attributes {stable_mosaic.version = 11 : i64} {
  func.func @kernel(%arg0: i32, %arg1: i32, %arg2: memref<8x16x16xbf16, #tpu.memory_space<vmem>>, %arg3: memref<16x256xbf16, #tpu.memory_space<vmem>>, %arg4: memref<32x16xbf16, #tpu.memory_space<vmem>>, %arg5: memref<1x16x128xf32, #tpu.memory_space<vmem>>) attributes {dimension_semantics = [#tpu.dimension_semantics<parallel>, #tpu.dimension_semantics<arbitrary>], iteration_bounds = array<i64: 1, 1>, scalar_prefetch = 0 : i64, scratch_operands = 0 : i64, tpu.core_type = #tpu.core_type<tc>, window_params = [{transform_indices = @transform_0, window_bounds = array<i64: 8, 16, 16>}, {pipeline_mode = #tpu.pipeline_mode<synchronous>, transform_indices = @transform_1, window_bounds = array<i64: 16, 256>}, {pipeline_mode = #tpu.pipeline_mode<synchronous>, transform_indices = @transform_2, window_bounds = array<i64: 32, 16>}, {transform_indices = @transform_3, window_bounds = array<i64: 1, 16, 128>}]} {
    %c0_i32 = arith.constant 0 : i32
    %0 = arith.cmpi eq, %arg1, %c0_i32 : i32
    %1 = arith.extui %0 : i1 to i32
    %c0_i32_0 = arith.constant 0 : i32
    %2 = arith.cmpi ne, %1, %c0_i32_0 : i32
    scf.if %2 {
      %cst_15 = arith.constant 0.000000e+00 : f32
      %27 = vector.broadcast %cst_15 : f32 to vector<1x16x128xf32>
      %c0_16 = arith.constant 0 : index
      %c0_17 = arith.constant 0 : index
      %c0_18 = arith.constant 0 : index
      %28 = vector.load %arg5[%c0_16, %c0_17, %c0_18] : memref<1x16x128xf32, #tpu.memory_space<vmem>>, vector<1x16x128xf32>
      tpu.vector_store %arg5[%c0_16, %c0_17, %c0_18], %27 {strides = array<i32>} : memref<1x16x128xf32, #tpu.memory_space<vmem>>, vector<1x16x128xf32>,
    } else {
    }
    %c0 = arith.constant 0 : index
    %c0_1 = arith.constant 0 : index
    %c0_2 = arith.constant 0 : index
    %3 = vector.load %arg2[%c0, %c0_1, %c0_2] : memref<8x16x16xbf16, #tpu.memory_space<vmem>>, vector<8x16x16xbf16>
    %4 = vector.shape_cast %3 : vector<8x16x16xbf16> to vector<128x16xbf16>
    %c0_3 = arith.constant 0 : index
    %c0_4 = arith.constant 0 : index
    %5 = vector.load %arg3[%c0_3, %c0_4] : memref<16x256xbf16, #tpu.memory_space<vmem>>, vector<16x256xbf16>
    %cst = arith.constant dense<0.000000e+00> : vector<128x256xf32>
    %6 = tpu.matmul %4, %5, %cst {dimension_numbers = #tpu.dot_dimension_numbers<[1], [0], [0], [1], [0, 0, 1, 1], [], []>} : vector<128x16xbf16>, vector<16x256xbf16>, vector<128x256xf32> -> vector<128x256xf32>
    %7 = arith.truncf %6 : vector<128x256xf32> to vector<128x256xbf16>
    %8 = vector.shape_cast %7 : vector<128x256xbf16> to vector<8x16x256xbf16>
    %c0_5 = arith.constant 0 : index
    %c0_6 = arith.constant 0 : index
    %9 = vector.load %arg4[%c0_5, %c0_6] : memref<32x16xbf16, #tpu.memory_space<vmem>>, vector<32x16xbf16>
    %10 = vector.shape_cast %9 : vector<32x16xbf16> to vector<1x32x16xbf16>
    %11 = vector.broadcast %10 : vector<1x32x16xbf16> to vector<8x32x16xbf16>
    "tpu.trace_start"() <{level = 10 : i32, message = "buh,bhp->bup"}> : () -> ()
    %cst_7 = arith.constant dense<0.000000e+00> : vector<8x32x256xf32>
    %12 = tpu.matmul %11, %8, %cst_7 {dimension_numbers = #tpu.dot_dimension_numbers<[2], [1], [1], [2], [0, 0, 0, 1, 1, 2], [0], [0]>} : vector<8x32x16xbf16>, vector<8x16x256xbf16>, vector<8x32x256xf32> -> vector<8x32x256xf32>
    "tpu.trace_stop"() : () -> ()
    %13 = vector.extract_strided_slice %12 {offsets = [0, 0, 0], sizes = [8, 16, 128], strides = [1, 1, 1]} : vector<8x32x256xf32> to vector<8x16x128xf32>
    %14 = vector.extract_strided_slice %12 {offsets = [0, 16, 128], sizes = [8, 16, 128], strides = [1, 1, 1]} : vector<8x32x256xf32> to vector<8x16x128xf32>
    %15 = arith.subf %13, %14 : vector<8x16x128xf32>
    %16 = vector.extract_strided_slice %12 {offsets = [0, 0, 128], sizes = [8, 16, 128], strides = [1, 1, 1]} : vector<8x32x256xf32> to vector<8x16x128xf32>
    %17 = vector.extract_strided_slice %12 {offsets = [0, 16, 0], sizes = [8, 16, 128], strides = [1, 1, 1]} : vector<8x32x256xf32> to vector<8x16x128xf32>
    %18 = arith.addf %16, %17 : vector<8x16x128xf32>
    %c0_8 = arith.constant 0 : index
    %c0_9 = arith.constant 0 : index
    %c0_10 = arith.constant 0 : index
    %19 = vector.load %arg5[%c0_8, %c0_9, %c0_10] : memref<1x16x128xf32, #tpu.memory_space<vmem>>, vector<1x16x128xf32>
    %20 = math.absf %15 : vector<8x16x128xf32>
    %21 = math.absf %18 : vector<8x16x128xf32>
    %22 = arith.addf %20, %21 : vector<8x16x128xf32>
    %cst_11 = arith.constant dense<0.000000e+00> : vector<16x128xf32>
    %23 = vector.multi_reduction <add>, %22, %cst_11 [0] : vector<8x16x128xf32> to vector<16x128xf32>
    %24 = vector.shape_cast %23 : vector<16x128xf32> to vector<1x16x128xf32>
    %25 = arith.addf %19, %24 : vector<1x16x128xf32>
    %c0_12 = arith.constant 0 : index
    %c0_13 = arith.constant 0 : index
    %c0_14 = arith.constant 0 : index
    %26 = vector.load %arg5[%c0_12, %c0_13, %c0_14] : memref<1x16x128xf32, #tpu.memory_space<vmem>>, vector<1x16x128xf32>
    tpu.vector_store %arg5[%c0_12, %c0_13, %c0_14], %25 {strides = array<i32>} : memref<1x16x128xf32, #tpu.memory_space<vmem>>, vector<1x16x128xf32>,
    return
  }
  func.func @transform_0(%arg0: i32, %arg1: i32) -> (i32, i32, i32) {
    %c1_i32 = arith.constant 1 : i32
    %0 = arith.muli %arg0, %c1_i32 : i32
    %1 = arith.addi %0, %arg1 : i32
    %c0_i32 = arith.constant 0 : i32
    %c0_i32_0 = arith.constant 0 : i32
    %c0_i32_1 = arith.constant 0 : i32
    return %1, %c0_i32, %c0_i32_0 : i32, i32, i32
  }
  func.func @transform_1(%arg0: i32, %arg1: i32) -> (i32, i32) {
    %c0_i32 = arith.constant 0 : i32
    %c0_i32_0 = arith.constant 0 : i32
    %c0_i32_1 = arith.constant 0 : i32
    return %c0_i32, %c0_i32_0 : i32, i32
  }
  func.func @transform_2(%arg0: i32, %arg1: i32) -> (i32, i32) {
    %c0_i32 = arith.constant 0 : i32
    %c0_i32_0 = arith.constant 0 : i32
    %c0_i32_1 = arith.constant 0 : i32
    return %c0_i32, %c0_i32_0 : i32, i32
  }
  func.func @transform_3(%arg0: i32, %arg1: i32) -> (i32, i32, i32) {
    %c0_i32 = arith.constant 0 : i32
    %c0_i32_0 = arith.constant 0 : i32
    %c0_i32_1 = arith.constant 0 : i32
    return %arg0, %c0_i32, %c0_i32_0 : i32, i32, i32
  }
}

</mosaic_0001>

<bundles_post_ra>
// kernel: fft_loss.1
= control target key start
LH: loop header
LB: loop body
LE: loop exit
PB: predicated region body
PF: predicated region fallthrough
CT: control target
= control target key end

     0   :  { %v873_v1 = vmov 0   ;;  %vm114_vm0 = vcmask 130048   ;;  %s1034_s1 = inlined_call_operand.vmem [shape: bf16[16,256], index: 1, kind: input, shape index: {}]   ;;  %s1035_s0 = inlined_call_operand.vmem [shape: bf16[8,16,16], index: 0, kind: input, shape index: {}]   ;;  %s1036_s2 = inlined_call_operand.vmem [shape: bf16[32,16], index: 2, kind: input, shape index: {}]   ;;  %s1037_s3 = inlined_call_operand.vmem [shape: f32[1,16,128], index: 3, kind: output, shape index: {}]  }
   0x1   :  { %v860_v0 = vld [vmem:[%s1034_s1 + $0x4] ss:$8 sps:$4 sm:$0xff]   ;;  %171 = vmatprep.mubr.bf16.mxu0 %v873_v1  ;;  %320 = vmatprep.mubr.bf16.mxu1 %v873_v1  ;;  %v862_v2 = vld [vmem:[%s1034_s1] ss:$8 sps:$4 sm:$0xff]   ;;  %v865_v5 = vld [vmem:[%s1035_s0 + $0x10] sm:$0xff]  }
   0x2   :  { %153 = vmatprep.subr.bf16.mxu0 %v860_v0  ;;  %v863_v3 = vld [vmem:[%s1035_s0] sm:$0xff]   ;;  %v864_v4 = vld [vmem:[%s1035_s0 + $0x8] sm:$0xff]   ;;  %v866_v6 = vld [vmem:[%s1035_s0 + $0x18] sm:$0xff]  }
   0x3   :  { %154 = vmatpush1.bf16.msra.mxu0 %v862_v2  ;;  %v867_v7 = vld [vmem:[%s1035_s0 + $0x20] sm:$0xff]   ;;  %v868_v8 = vld [vmem:[%s1035_s0 + $0x28] sm:$0xff]   ;;  %v869_v9 = vld [vmem:[%s1035_s0 + $0x30] sm:$0xff]  }
   0x4   :  { %v870_v10 = vld [vmem:[%s1035_s0 + $0x38] sm:$0xff]   ;;  %v945_v18 = vld [vmem:[%s1036_s2] sm:$0xff]   ;;  %v953_v25 = vld [vmem:[%s1036_s2 + $0x8] sm:$0xff]  }
   0x6   :  { %832 = vmatmul.mubr.msk.bf16.vlgmr.msra.gmra.mxu0 %vm114_vm0, %v863_v3 }
   0x7   :  { %181 = vmatprep.mubr.bf16.mxu0 %v873_v1 }
   0xe   :  { %833 = vmatmul.mubr.msk.bf16.gmra.mxu0 %vm114_vm0, %v864_v4 }
   0xf   :  { %191 = vmatprep.mubr.bf16.mxu0 %v873_v1 }
  0x16   :  { %834 = vmatmul.mubr.msk.bf16.gmra.mxu0 %vm114_vm0, %v865_v5 }
  0x17   :  { %201 = vmatprep.mubr.bf16.mxu0 %v873_v1 }
  0x1e   :  { %835 = vmatmul.mubr.msk.bf16.gmra.mxu0 %vm114_vm0, %v866_v6 }
  0x1f   :  { %211 = vmatprep.mubr.bf16.mxu0 %v873_v1 }
  0x26   :  { %836 = vmatmul.mubr.msk.bf16.gmra.mxu0 %vm114_vm0, %v867_v7 }
  0x27   :  { %221 = vmatprep.mubr.bf16.mxu0 %v873_v1 }
  0x2e   :  { %837 = vmatmul.mubr.msk.bf16.gmra.mxu0 %vm114_vm0, %v868_v8 }
  0x2f   :  { %231 = vmatprep.mubr.bf16.mxu0 %v873_v1 }
  0x36   :  { %838 = vmatmul.mubr.msk.bf16.gmra.mxu0 %vm114_vm0, %v869_v9 }
  0x37   :  { %241 = vmatprep.mubr.bf16.mxu0 %v873_v1 }
  0x3e   :  { %839 = vmatmul.mubr.msk.bf16.gmra.mxu0 %vm114_vm0, %v870_v10 }
  0x3f   :  { %532 = vmatprep.mubr.bf16.mxu0 %v873_v1 }
  0xc6   :  { %v173_v11 = vpop.f32.mrf.mxu0 }
  0xc8   :  { %v175_v12 = vpop.f32.mrf.mxu0 }
  0xca   :  { %v177_v13 = vpop.f32.mrf.mxu0 }
  0xcb   :  { %v252_v16 = vpack.c.bf16 %v177_v13, %v173_v11 }
  0xcc   :  { %v179_v14 = vpop.f32.mrf.mxu0 }
  0xcd   :  { %v253_v15 = vpack.c.bf16 %v179_v14, %v175_v12 }
  0xce   :  { %v183_v17 = vpop.f32.mrf.mxu0 }
  0xcf   :  { %302 = vmatprep.subr.bf16.mxu1 %v253_v15 }
  0xd0   :  { %v185_v19 = vpop.f32.mrf.mxu0  ;;  %303 = vmatpush1.bf16.msra.mxu1 %v252_v16 }
  0xd2   :  { %v187_v20 = vpop.f32.mrf.mxu0 }
  0xd3   :  { %842 = vmatmul.mubr.msk.bf16.vlgmr.msra.gmra.mxu1 %vm114_vm0, %v945_v18  ;;  %v254_v21 = vpack.c.bf16 %v187_v20, %v183_v17 }
  0xd4   :  { %v189_v22 = vpop.f32.mrf.mxu0  ;;  %330 = vmatprep.mubr.bf16.mxu1 %v873_v1 }
  0xd5   :  { %v255_v23 = vpack.c.bf16 %v189_v22, %v185_v19 }
  0xd6   :  { %v193_v24 = vpop.f32.mrf.mxu0 }
  0xd7   :  { %355 = vmatprep.subr.bf16.mxu1 %v255_v23 }
  0xd8   :  { %v195_v26 = vpop.f32.mrf.mxu0  ;;  %356 = vmatpush1.bf16.msra.mxu1 %v254_v21 }
  0xda   :  { %v197_v27 = vpop.f32.mrf.mxu0 }
  0xdb   :  { %843 = vmatmul.mubr.msk.bf16.gmra.mxu1 %vm114_vm0, %v953_v25  ;;  %v256_v31 = vpack.c.bf16 %v197_v27, %v193_v24 }
  0xdc   :  { %v199_v28 = vpop.f32.mrf.mxu0  ;;  %373 = vmatprep.mubr.bf16.mxu1 %v873_v1 }
  0xdd   :  { %v257_v29 = vpack.c.bf16 %v199_v28, %v195_v26 }
  0xde   :  { %v203_v30 = vpop.f32.mrf.mxu0 }
  0xdf   :  { %408 = vmatprep.subr.bf16.mxu1 %v257_v29 }
  0xe0   :  { %v205_v32 = vpop.f32.mrf.mxu0 }
  0xe2   :  { %v207_v33 = vpop.f32.mrf.mxu0 }
  0xe3   :  { %844 = vmatmul.mubr.msk.bf16.vlgmr.msra.gmra.mxu1 %vm114_vm0, %v945_v18  ;;  %v258_v43 = vpack.c.bf16 %v207_v33, %v203_v30 }
  0xe4   :  { %409 = vmatpush1.bf16.msra.mxu1 %v256_v31  ;;  %v209_v34 = vpop.f32.mrf.mxu0  ;;  %383 = vmatprep.mubr.bf16.mxu1 %v873_v1 }
  0xe5   :  { %v259_v35 = vpack.c.bf16 %v209_v34, %v205_v32 }
  0xe6   :  { %v213_v36 = vpop.f32.mrf.mxu0 }
  0xe7   :  { %461 = vmatprep.subr.bf16.mxu1 %v259_v35 }
  0xe8   :  { %v215_v37 = vpop.f32.mrf.mxu0 }
  0xea   :  { %v217_v38 = vpop.f32.mrf.mxu0 }
  0xeb   :  { %845 = vmatmul.mubr.msk.bf16.gmra.mxu1 %vm114_vm0, %v953_v25  ;;  %v260_v39 = vpack.c.bf16 %v217_v38, %v213_v36 }
  0xec   :  { %v219_v40 = vpop.f32.mrf.mxu0  ;;  %426 = vmatprep.mubr.bf16.mxu1 %v873_v1 }
  0xed   :  { %v261_v41 = vpack.c.bf16 %v219_v40, %v215_v37 }
  0xee   :  { %v223_v42 = vpop.f32.mrf.mxu0 }
  0xef   :  { %514 = vmatprep.subr.bf16.mxu0 %v261_v41 }
  0xf0   :  { %515 = vmatpush1.bf16.msra.mxu0 %v260_v39  ;;  %v225_v44 = vpop.f32.mrf.mxu0 }
  0xf2   :  { %v227_v45 = vpop.f32.mrf.mxu0 }
  0xf3   :  { %846 = vmatmul.mubr.msk.bf16.vlgmr.msra.gmra.mxu1 %vm114_vm0, %v945_v18  ;;  %850 = vmatmul.mubr.msk.bf16.vlgmr.msra.gmra.mxu0 %vm114_vm0, %v945_v18  ;;  %v262_v55 = vpack.c.bf16 %v227_v45, %v223_v42 }
  0xf4   :  { %462 = vmatpush1.bf16.msra.mxu1 %v258_v43  ;;  %436 = vmatprep.mubr.bf16.mxu1 %v873_v1  ;;  %v229_v46 = vpop.f32.mrf.mxu0 }
  0xf5   :  { %v263_v47 = vpack.c.bf16 %v229_v46, %v225_v44  ;;  %542 = vmatprep.mubr.bf16.mxu0 %v873_v1 }
  0xf6   :  { %v233_v48 = vpop.f32.mrf.mxu0 }
  0xf7   :  { %567 = vmatprep.subr.bf16.mxu1 %v263_v47 }
  0xf8   :  { %v235_v49 = vpop.f32.mrf.mxu0 }
  0xfa   :  { %v237_v50 = vpop.f32.mrf.mxu0 }
  0xfb   :  { %847 = vmatmul.mubr.msk.bf16.gmra.mxu1 %vm114_vm0, %v953_v25  ;;  %851 = vmatmul.mubr.msk.bf16.gmra.mxu0 %vm114_vm0, %v953_v25  ;;  %v264_v51 = vpack.c.bf16 %v237_v50, %v233_v48 }
  0xfc   :  { %479 = vmatprep.mubr.bf16.mxu1 %v873_v1  ;;  %v239_v52 = vpop.f32.mrf.mxu0  ;;  %638 = vmatprep.mubr.bf16.mxu0 %v873_v1 }
  0xfd   :  { %v265_v53 = vpack.c.bf16 %v239_v52, %v235_v49 }
  0xfe   :  { %v243_v54 = vpop.f32.mrf.mxu0 }
  0xff   :  { %620 = vmatprep.subr.bf16.mxu0 %v265_v53 }
 0x100   :  { %621 = vmatpush1.bf16.msra.mxu0 %v264_v51  ;;  %v245_v56 = vpop.f32.mrf.mxu0 }
 0x102   :  { %v247_v57 = vpop.f32.mrf.mxu0 }
 0x103   :  { %848 = vmatmul.mubr.msk.bf16.vlgmr.msra.gmra.mxu1 %vm114_vm0, %v945_v18  ;;  %854 = vmatmul.mubr.msk.bf16.vlgmr.msra.gmra.mxu0 %vm114_vm0, %v945_v18  ;;  %v266_v60 = vpack.c.bf16 %v247_v57, %v243_v54 }
 0x104   :  { %489 = vmatprep.mubr.bf16.mxu1 %v873_v1  ;;  %568 = vmatpush1.bf16.msra.mxu1 %v262_v55  ;;  %v249_v58 = vpop.f32.mrf.mxu0 }
 0x105   :  { %v267_v59 = vpack.c.bf16 %v249_v58, %v245_v56  ;;  %648 = vmatprep.mubr.bf16.mxu0 %v873_v1 }
 0x107   :  { %673 = vmatprep.subr.bf16.mxu1 %v267_v59 }
 0x10b   :  { %849 = vmatmul.mubr.msk.bf16.gmra.mxu1 %vm114_vm0, %v953_v25  ;;  %855 = vmatmul.mubr.msk.bf16.gmra.mxu0 %vm114_vm0, %v953_v25 }
 0x10c   :  { %585 = vmatprep.mubr.bf16.mxu1 %v873_v1 }
 0x113   :  { %852 = vmatmul.mubr.msk.bf16.vlgmr.msra.gmra.mxu1 %vm114_vm0, %v945_v18 }
 0x114   :  { %595 = vmatprep.mubr.bf16.mxu1 %v873_v1  ;;  %674 = vmatpush1.bf16.msra.mxu1 %v266_v60 }
 0x11b   :  { %853 = vmatmul.mubr.msk.bf16.gmra.mxu1 %vm114_vm0, %v953_v25 }
 0x11c   :  { %691 = vmatprep.mubr.bf16.mxu1 %v873_v1 }
 0x123   :  { %856 = vmatmul.mubr.msk.bf16.vlgmr.msra.gmra.mxu1 %vm114_vm0, %v945_v18 }
 0x124   :  { %701 = vmatprep.mubr.bf16.mxu1 %v873_v1 }
 0x12b   :  { %857 = vmatmul.mubr.msk.bf16.gmra.mxu1 %vm114_vm0, %v953_v25 }
 0x193   :  { %v322_v61 = vpop.f32.mrf.mxu1 }
 0x195   :  { %v324_v62 = vpop.f32.mrf.mxu1 }
 0x197   :  { %v326_v63 = vpop.f32.mrf.mxu1 }
 0x199   :  { %v328_v0 = vpop.f32.mrf.mxu1 }
 0x19b   :  { %v332_v2 = vpop.f32.mrf.mxu1 }
 0x19c   :  { %v728_v3 = vadd.f32 %v332_v2, %v324_v62 }
 0x19d   :  { %v334_v4 = vpop.f32.mrf.mxu1 }
 0x19e   :  { %v712_v5 = vsub.f32 %v322_v61, %v334_v4  ;;  %v762_v7 = vand.u32 2147483647, %v728_v3 }
 0x19f   :  { %v336_v6 = vpop.f32.mrf.mxu1 }
 0x1a0   :  { %v746_v8 = vand.u32 2147483647, %v712_v5  ;;  %v729_v9 = vadd.f32 %v336_v6, %v328_v0 }
 0x1a1   :  { %v338_v10 = vpop.f32.mrf.mxu1 }
 0x1a2   :  { %v998_v11 = vadd.f32 %v762_v7, %v746_v8  ;;  %v713_v12 = vsub.f32 %v326_v63, %v338_v10  ;;  %v763_v13 = vand.u32 2147483647, %v729_v9 }
 0x1a3   :  { %v375_v1 = vpop.f32.mrf.mxu1 }
 0x1a4   :  { %v747_v14 = vand.u32 2147483647, %v713_v12 }
 0x1a5   :  { %v377_v15 = vpop.f32.mrf.mxu1 }
 0x1a6   :  { %v1000_v16 = vadd.f32 %v763_v13, %v747_v14 }
 0x1a7   :  { %v379_v17 = vpop.f32.mrf.mxu1 }
 0x1a9   :  { %v381_v18 = vpop.f32.mrf.mxu1 }
 0x1ab   :  { %v385_v19 = vpop.f32.mrf.mxu1 }
 0x1ac   :  { %v730_v54 = vadd.f32 %v385_v19, %v377_v15 }
 0x1ad   :  { %v387_v20 = vpop.f32.mrf.mxu1 }
 0x1ae   :  { %v714_v52 = vsub.f32 %v375_v1, %v387_v20  ;;  %v764_v62 = vand.u32 2147483647, %v730_v54 }
 0x1af   :  { %v389_v21 = vpop.f32.mrf.mxu1 }
 0x1b0   :  { %v748_v58 = vand.u32 2147483647, %v714_v52  ;;  %v731_v2 = vadd.f32 %v389_v21, %v381_v18 }
 0x1b1   :  { %v391_v22 = vpop.f32.mrf.mxu1 }
 0x1b2   :  { %v715_v59 = vsub.f32 %v379_v17, %v391_v22  ;;  %v780_v6 = vadd.f32 %v764_v62, %v748_v58  ;;  %v765_v19 = vand.u32 2147483647, %v731_v2 }
 0x1b3   :  { %v428_v23 = vpop.f32.mrf.mxu1  ;;  %v1002_v24 = vpop.f32.mrf.mxu0 }
 0x1b4   :  { %v749_v7 = vand.u32 2147483647, %v715_v59  ;;  %v794_v18 = vadd.f32 %v780_v6, %v998_v11 }
 0x1b5   :  { %v430_v25 = vpop.f32.mrf.mxu1  ;;  %v536_v26 = vpop.f32.mrf.mxu0 }
 0x1b7   :  { %v432_v27 = vpop.f32.mrf.mxu1  ;;  %v1004_v28 = vpop.f32.mrf.mxu0 }
 0x1b9   :  { %v434_v29 = vpop.f32.mrf.mxu1  ;;  %v1006_v30 = vpop.f32.mrf.mxu0 }
 0x1bb   :  { %v438_v31 = vpop.f32.mrf.mxu1  ;;  %v544_v32 = vpop.f32.mrf.mxu0 }
 0x1bc   :  { %v732_v60 = vadd.f32 %v438_v31, %v430_v25  ;;  %v736_v12 = vadd.f32 %v544_v32, %v536_v26  ;;  %v781_v31 = vadd.f32 %v765_v19, %v749_v7 }
 0x1bd   :  { %v440_v33 = vpop.f32.mrf.mxu1  ;;  %v546_v35 = vpop.f32.mrf.mxu0 }
 0x1be   :  { %v716_v56 = vsub.f32 %v428_v23, %v440_v33  ;;  %v766_v9 = vand.u32 2147483647, %v732_v60  ;;  %v720_v1 = vsub.f32 %v1002_v24, %v546_v35  ;;  %v801_v52 = vadd.f32 %v781_v31, %v1000_v16 }
 0x1bf   :  { %v442_v34 = vpop.f32.mrf.mxu1  ;;  %v548_v38 = vpop.f32.mrf.mxu0 }
 0x1c0   :  { %v750_v3 = vand.u32 2147483647, %v716_v56  ;;  %v733_v10 = vadd.f32 %v442_v34, %v434_v29  ;;  %v754_v29 = vand.u32 2147483647, %v720_v1  ;;  %v737_v34 = vadd.f32 %v548_v38, %v1006_v30 }
 0x1c1   :  { %v444_v36 = vpop.f32.mrf.mxu1  ;;  %v1008_v41 = vpop.f32.mrf.mxu0 }
 0x1c2   :  { %v717_v4 = vsub.f32 %v432_v27, %v444_v36  ;;  %v782_v20 = vadd.f32 %v766_v9, %v750_v3  ;;  %v767_v33 = vand.u32 2147483647, %v733_v10  ;;  %v770_v36 = vand.u32 2147483647, %v736_v12 }
 0x1c3   :  { %v481_v37 = vpop.f32.mrf.mxu1  ;;  %v1010_v44 = vpop.f32.mrf.mxu0 }
 0x1c4   :  { %v751_v22 = vand.u32 2147483647, %v717_v4  ;;  %v786_v54 = vadd.f32 %v770_v36, %v754_v29 }
 0x1c5   :  { %v483_v39 = vpop.f32.mrf.mxu1  ;;  %v642_v47 = vpop.f32.mrf.mxu0 }
 0x1c7   :  { %v485_v40 = vpop.f32.mrf.mxu1  ;;  %v1012_v50 = vpop.f32.mrf.mxu0 }
 0x1c9   :  { %v487_v42 = vpop.f32.mrf.mxu1  ;;  %v1016_v55 = vpop.f32.mrf.mxu0 }
 0x1cb   :  { %v491_v43 = vpop.f32.mrf.mxu1  ;;  %v650_v0 = vpop.f32.mrf.mxu0 }
 0x1cc   :  { %v734_v8 = vadd.f32 %v491_v43, %v483_v39  ;;  %v795_v39 = vadd.f32 %v794_v18, %v782_v20  ;;  %v721_v43 = vsub.f32 %v1004_v28, %v1008_v41  ;;  %v740_v11 = vadd.f32 %v650_v0, %v642_v47 }
 0x1cd   :  { %v493_v45 = vpop.f32.mrf.mxu1  ;;  %v652_v17 = vpop.f32.mrf.mxu0 }
 0x1ce   :  { %v718_v63 = vsub.f32 %v481_v37, %v493_v45  ;;  %v768_v21 = vand.u32 2147483647, %v734_v8  ;;  %v755_v28 = vand.u32 2147483647, %v721_v43  ;;  %v774_v62 = vand.u32 2147483647, %v740_v11 }
 0x1cf   :  { %v495_v46 = vpop.f32.mrf.mxu1  ;;  %v654_v37 = vpop.f32.mrf.mxu0 }
 0x1d0   :  { %v752_v14 = vand.u32 2147483647, %v718_v63  ;;  %v735_v25 = vadd.f32 %v495_v46, %v487_v42 }
 0x1d1   :  { %v497_v48 = vpop.f32.mrf.mxu1  ;;  %v656_v59 = vpop.f32.mrf.mxu0 }
 0x1d2   :  { %v719_v15 = vsub.f32 %v485_v40, %v497_v48  ;;  %v784_v32 = vadd.f32 %v768_v21, %v752_v14  ;;  %v783_v40 = vadd.f32 %v767_v33, %v751_v22  ;;  %v769_v42 = vand.u32 2147483647, %v735_v25 }
 0x1d3   :  { %v587_v49 = vpop.f32.mrf.mxu1  ;;  %v724_v48 = vsub.f32 %v1010_v44, %v652_v17  ;;  %v741_v44 = vadd.f32 %v654_v37, %v1016_v55 }
 0x1d4   :  { %v753_v24 = vand.u32 2147483647, %v719_v15  ;;  %v796_v30 = vadd.f32 %v795_v39, %v784_v32  ;;  %v802_v60 = vadd.f32 %v801_v52, %v783_v40 }
 0x1d5   :  { %v589_v51 = vpop.f32.mrf.mxu1  ;;  %v758_v63 = vand.u32 2147483647, %v724_v48  ;;  %v775_v12 = vand.u32 2147483647, %v741_v44 }
 0x1d6   :  { %v785_v38 = vadd.f32 %v769_v42, %v753_v24  ;;  %v797_v2 = vadd.f32 %v796_v30, %v786_v54 }
 0x1d7   :  { %v1014_v53 = vpop.f32.mrf.mxu1  ;;  %v790_v8 = vadd.f32 %v774_v62, %v758_v63 }
 0x1d8   :  { %v803_v3 = vadd.f32 %v802_v60, %v785_v38 }
 0x1d9   :  { %v593_v57 = vpop.f32.mrf.mxu1 }
 0x1db   :  { %v597_v61 = vpop.f32.mrf.mxu1 }
 0x1dc   :  { %v738_v35 = vadd.f32 %v597_v61, %v589_v51  ;;  %v771_v61 = vand.u32 2147483647, %v737_v34 }
 0x1dd   :  { %v599_v5 = vpop.f32.mrf.mxu1 }
 0x1de   :  { %v722_v27 = vsub.f32 %v587_v49, %v599_v5  ;;  %v772_v51 = vand.u32 2147483647, %v738_v35  ;;  %v787_v6 = vadd.f32 %v771_v61, %v755_v28 }
 0x1df   :  { %v601_v13 = vpop.f32.mrf.mxu1 }
 0x1e0   :  { %v756_v46 = vand.u32 2147483647, %v722_v27  ;;  %v739_v58 = vadd.f32 %v601_v13, %v593_v57  ;;  %v804_v14 = vadd.f32 %v803_v3, %v787_v6 }
 0x1e1   :  { %v603_v23 = vpop.f32.mrf.mxu1 }
 0x1e2   :  { %v723_v49 = vsub.f32 %v1014_v53, %v603_v23  ;;  %v788_v47 = vadd.f32 %v772_v51, %v756_v46  ;;  %v725_v53 = vsub.f32 %v1012_v50, %v656_v59  ;;  %v773_v4 = vand.u32 2147483647, %v739_v58 }
 0x1e3   :  { %v693_v26 = vpop.f32.mrf.mxu1 }
 0x1e4   :  { %v757_v0 = vand.u32 2147483647, %v723_v49  ;;  %v798_v7 = vadd.f32 %v797_v2, %v788_v47  ;;  %v759_v1 = vand.u32 2147483647, %v725_v53 }
 0x1e5   :  { %v695_v45 = vpop.f32.mrf.mxu1 }
 0x1e6   :  { %v789_v9 = vadd.f32 %v773_v4, %v757_v0  ;;  %v799_v50 = vadd.f32 %v798_v7, %v790_v8  ;;  %v791_v18 = vadd.f32 %v775_v12, %v759_v1 }
 0x1e7   :  { %v697_v56 = vpop.f32.mrf.mxu1 }
 0x1e8   :  { %v805_v20 = vadd.f32 %v804_v14, %v789_v9 }
 0x1e9   :  { %v699_v41 = vpop.f32.mrf.mxu1 }
 0x1ea   :  { %v806_v31 = vadd.f32 %v805_v20, %v791_v18 }
 0x1eb   :  { %v703_v16 = vpop.f32.mrf.mxu1 }
 0x1ec   :  { %v742_v5 = vadd.f32 %v703_v16, %v695_v45 }
 0x1ed   :  { %v705_v57 = vpop.f32.mrf.mxu1 }
 0x1ee   :  { %v726_v10 = vsub.f32 %v693_v26, %v705_v57  ;;  %v776_v15 = vand.u32 2147483647, %v742_v5 }
 0x1ef   :  { %v707_v13 = vpop.f32.mrf.mxu1 }
 0x1f0   :  { %v760_v17 = vand.u32 2147483647, %v726_v10  ;;  %v743_v55 = vadd.f32 %v707_v13, %v699_v41 }
 0x1f1   :  { %v709_v19 = vpop.f32.mrf.mxu1 }
 0x1f2   :  { %v792_v22 = vadd.f32 %v776_v15, %v760_v17  ;;  %v727_v23 = vsub.f32 %v697_v56, %v709_v19  ;;  %v777_v25 = vand.u32 2147483647, %v743_v55 }
 0x1f4   :  { %v800_v21 = vadd.f32 %v799_v50, %v792_v22  ;;  %v761_v27 = vand.u32 2147483647, %v727_v23 }
 0x1f6   :  { %v793_v33 = vadd.f32 %v777_v25, %v761_v27  ;;  %810 = vst [vmem:[%s1037_s3] sm:$0xff] %v800_v21 }
 0x1f8   :  { %v807_v36 = vadd.f32 %v806_v31, %v793_v33 }
 0x1fa   :  { %811 = vst [vmem:[%s1037_s3 + $0x8] sm:$0xff] %v807_v36 }

</bundles_post_ra>
